<compile_context>
chip_gen: v5e
topology: v5e:2x2
jax: 0.10.0
libtpu: 0.0.40
codegen_flags: <defaults>
</compile_context>

<pallas_src>
import functools
import math

import jax
import jax.numpy as jnp
from jax.experimental import pallas as pl
from jax.experimental.pallas import tpu as pltpu


def _round_up(x, m):
    return ((x + m - 1) // m) * m


# ----------------------------------------------------------------------------
# Fused kernel: the whole L-layer NormGRUCellLateReset stack per batch tile.
#   gates  = [cur ; h_l] @ [W_ih_l ; W_hh_l]          (bt, 3H), f32 accum
#   gates  = LayerNorm(gates, eps=1e-3) * gamma_l + beta_l
#   reset  = sigmoid(gates[:, 0:H])
#   update = sigmoid(gates[:, H:2H] - 1)              (update_bias = -1)
#   newval = tanh(reset * gates[:, 2H:3H])
#   h_new  = h_l + update * (newval - h_l)
# ----------------------------------------------------------------------------
def _gru_stack_kernel(x_ref, h_ref, w0_ref, wr_ref, g_ref, b_ref,
                      o_ref, inp_ref, *, hidden, num_layers, din_pad):
    H = hidden
    L = num_layers
    K0 = din_pad + H
    f32 = jnp.float32
    wdt = w0_ref.dtype                       # bf16 MXU operand dtype

    gamma = g_ref[...]                       # (L, 1, 3H) f32, tiny, load once
    beta = b_ref[...]

    def cell(gates, h_prev, l):
        # One-pass LayerNorm (biased var): independent sum / sum-sq reductions.
        inv_n = 1.0 / gates.shape[-1]
        mean = jnp.sum(gates, axis=-1, keepdims=True) * inv_n
        meansq = jnp.sum(gates * gates, axis=-1, keepdims=True) * inv_n
        var = meansq - mean * mean
        g = (gates - mean) * jax.lax.rsqrt(var + 1e-3)
        g = g * gamma[l] + beta[l]
        reset = jax.nn.sigmoid(g[:, 0:H])
        update = jax.nn.sigmoid(g[:, H:2 * H] - 1.0)     # update_bias = -1
        newval = jnp.tanh(reset * g[:, 2 * H:3 * H])
        return h_prev + update * (newval - h_prev)       # == u*n + (1-u)*h

    # ---- layer 0: fused [x ; h0] @ [W_ih0 ; W_hh0], K = din_pad + H ----
    inp_ref[:, 0:din_pad] = x_ref[...].astype(wdt)
    inp_ref[:, din_pad:K0] = h_ref[:, 0:H].astype(wdt)
    h0 = h_ref[:, 0:H].astype(f32)
    gates = jnp.dot(inp_ref[:, 0:K0], w0_ref[...],
                    preferred_element_type=f32)          # (bt, 3H)
    cur = cell(gates, h0, 0)
    o_ref[:, 0:H] = cur.astype(o_ref.dtype)

    # ---- layers 1..L-1: fused [h_{l-1}' ; h_l] @ [W_ih_l ; W_hh_l], K = 2H ----
    for l in range(1, L):
        inp_ref[:, 0:H] = cur.astype(wdt)
        inp_ref[:, H:2 * H] = h_ref[:, l * H:(l + 1) * H].astype(wdt)
        h_l = h_ref[:, l * H:(l + 1) * H].astype(f32)
        gates = jnp.dot(inp_ref[:, 0:2 * H], wr_ref[l - 1],
                        preferred_element_type=f32)
        cur = cell(gates, h_l, l)
        o_ref[:, l * H:(l + 1) * H] = cur.astype(o_ref.dtype)


# ----------------------------------------------------------------------------
# Parameter construction: fused [W_ih ; W_hh] bf16 weights.
#   w0     : (din_pad + H, 3H)      rows [input_size:din_pad] are zero padding
#   w_rest : (max(L-1, 1), 2H, 3H)  per-layer fused weight (dummy zeros if L=1)
#   gamma/beta : (L, 1, 3H) f32     LayerNorm affine
# ----------------------------------------------------------------------------
def init_gru_stack_params(key, input_size, hidden_size, num_layers,
                          weight_dtype=jnp.bfloat16):
    H = hidden_size // num_layers
    assert H * num_layers == hidden_size, "Must be divisible"
    # TODO(synk): support H not a multiple of 128 by padding the gate lanes.
    assert H % 128 == 0, "layer_size must be a multiple of 128 (lane-aligned)"
    din_pad = _round_up(input_size, 128)
    threeH = 3 * H
    K0 = din_pad + H
    Lr = max(num_layers - 1, 1)

    w0 = jnp.zeros((K0, threeH), weight_dtype)
    w_rest = jnp.zeros((Lr, 2 * H, threeH), weight_dtype)
    gamma = jnp.ones((num_layers, 1, threeH), jnp.float32)
    beta = jnp.zeros((num_layers, 1, threeH), jnp.float32)

    # nn.Linear default init: U(-1/sqrt(fan_in), 1/sqrt(fan_in)); stored transposed.
    key, k1, k2 = jax.random.split(key, 3)
    b_ih = 1.0 / math.sqrt(input_size)
    b_hh = 1.0 / math.sqrt(H)
    w_ih0 = jax.random.uniform(k1, (input_size, threeH), jnp.float32, -b_ih, b_ih)
    w_hh0 = jax.random.uniform(k2, (H, threeH), jnp.float32, -b_hh, b_hh)
    w0 = w0.at[:input_size, :].set(w_ih0.astype(weight_dtype))
    w0 = w0.at[din_pad:K0, :].set(w_hh0.astype(weight_dtype))

    for li in range(1, num_layers):
        key, k1, k2 = jax.random.split(key, 3)
        b = 1.0 / math.sqrt(H)
        w_ih = jax.random.uniform(k1, (H, threeH), jnp.float32, -b, b)
        w_hh = jax.random.uniform(k2, (H, threeH), jnp.float32, -b, b)
        w_rest = w_rest.at[li - 1, 0:H, :].set(w_ih.astype(weight_dtype))
        w_rest = w_rest.at[li - 1, H:2 * H, :].set(w_hh.astype(weight_dtype))

    return {"w0": w0, "w_rest": w_rest, "gamma": gamma, "beta": beta,
            "input_size": input_size}


# ----------------------------------------------------------------------------
# GRUCellStack forward: one pallas_call, grid = (batch_tiles,).
# ----------------------------------------------------------------------------
def gru_cell_stack_forward(params, x, state, num_layers):
    """x: (B, input_size); state: (B, hidden_size) -> (B, hidden_size)."""
    w0, w_rest = params["w0"], params["w_rest"]
    gamma, beta = params["gamma"], params["beta"]
    L = num_layers
    Lr, twoH, threeH = w_rest.shape
    H = threeH // 3
    K0 = w0.shape[0]
    din_pad = K0 - H
    kmax = max(K0, 2 * H)

    B, din = x.shape
    assert din <= din_pad and state.shape == (B, L * H)

    # Batch tile: >=2 tiles for medium/large batches so a 2-TC chip (v7x) can
    # shard the "parallel" axis; rows padded to the f32 sublane multiple (8).
    if B <= 8:
        bt = 8
    else:
        bt = min(256, _round_up(-(-B // 2), 8))
    b_pad = _round_up(B, bt)
    n_bt = b_pad // bt

    x_pad = jnp.zeros((b_pad, din_pad), jnp.float32).at[:B, :din].set(
        x.astype(jnp.float32))
    if b_pad != B:
        state_in = jnp.zeros((b_pad, L * H), state.dtype).at[:B].set(state)
    else:
        state_in = state

    kernel = functools.partial(_gru_stack_kernel, hidden=H, num_layers=L,
                               din_pad=din_pad)

    # Advisory cost estimate for XLA's scheduler.
    flops = 2 * b_pad * (K0 * threeH + (L - 1) * 2 * H * threeH)
    transcendentals = b_pad * L * (threeH + 1)
    state_bytes = state_in.size * state_in.dtype.itemsize
    weight_bytes = ((w0.size + w_rest.size) * w0.dtype.itemsize
                    + (gamma.size + beta.size) * 4)
    bytes_accessed = int(x_pad.size * 4 + 2 * state_bytes + weight_bytes)

    # VMEM working set: double-buffered streaming blocks + resident weights +
    # bf16 input scratch + f32 gate temporaries, with headroom; capped at 80%
    # of the queried per-generation VMEM capacity (v5e/v6e 128 MiB, v7x 64 MiB).
    # TODO(synk): for very large layer sizes, additionally tile the 3H gate dim.
    per_tile_io = (bt * din_pad * 4
                   + 2 * bt * L * H * state_in.dtype.itemsize)
    need = (2 * per_tile_io + 2 * weight_bytes
            + bt * kmax * 2 + 8 * bt * threeH * 4)
    try:
        phys_vmem = int(pltpu.get_tpu_info().vmem_capacity_bytes)
    except Exception:
        phys_vmem = 64 * 1024 * 1024          # conservative (v7x per-TC)
    vmem_limit = int(min(max(need + (8 << 20), 32 << 20), (phys_vmem * 4) // 5))

    out = pl.pallas_call(
        kernel,
        out_shape=jax.ShapeDtypeStruct((b_pad, L * H), state.dtype),
        grid_spec=pltpu.PrefetchScalarGridSpec(
            num_scalar_prefetch=0,
            grid=(n_bt,),
            in_specs=[
                pl.BlockSpec((bt, din_pad), lambda b: (b, 0)),          # x
                pl.BlockSpec((bt, L * H), lambda b: (b, 0)),            # state
                pl.BlockSpec((K0, threeH), lambda b: (0, 0)),           # w0
                pl.BlockSpec((Lr, 2 * H, threeH), lambda b: (0, 0, 0)),  # w_rest
                pl.BlockSpec((L, 1, threeH), lambda b: (0, 0, 0)),      # gamma
                pl.BlockSpec((L, 1, threeH), lambda b: (0, 0, 0)),      # beta
            ],
            out_specs=pl.BlockSpec((bt, L * H), lambda b: (b, 0)),
            scratch_shapes=[pltpu.VMEM((bt, kmax), w0.dtype)],          # fused input
        ),
        compiler_params=pltpu.CompilerParams(
            dimension_semantics=("parallel",),
            vmem_limit_bytes=vmem_limit),
        cost_estimate=pl.CostEstimate(flops=flops,
                                      transcendentals=transcendentals,
                                      bytes_accessed=bytes_accessed),
    )(x_pad, state_in, w0, w_rest, gamma, beta)

    return out[:B]


# ----------------------------------------------------------------------------
# Pure-JAX reference (torch-style two-pass LayerNorm, same bf16 matmul
# operands) for the correctness check.
# ----------------------------------------------------------------------------
def _reference_forward(params, x, state, num_layers):
    w0, w_rest = params["w0"], params["w_rest"]
    gamma, beta = params["gamma"], params["beta"]
    din = params["input_size"]
    _, _, threeH = w_rest.shape
    H = threeH // 3
    din_pad = w0.shape[0] - H
    cur = x.astype(jnp.float32)
    outs = []
    for l in range(num_layers):
        h = state[:, l * H:(l + 1) * H].astype(jnp.float32)
        if l == 0:
            w_ih = w0[:din, :]
            w_hh = w0[din_pad:, :]
        else:
            w_ih = w_rest[l - 1, :H, :]
            w_hh = w_rest[l - 1, H:, :]
        gates = (jnp.dot(cur.astype(jnp.bfloat16), w_ih,
                         preferred_element_type=jnp.float32)
                 + jnp.dot(h.astype(jnp.bfloat16), w_hh,
                           preferred_element_type=jnp.float32))
        mean = gates.mean(-1, keepdims=True)
        var = ((gates - mean) ** 2).mean(-1, keepdims=True)
        gates = (gates - mean) * jax.lax.rsqrt(var + 1e-3) * gamma[l] + beta[l]
        reset = jax.nn.sigmoid(gates[:, :H])
        update = jax.nn.sigmoid(gates[:, H:2 * H] - 1.0)
        newval = jnp.tanh(reset * gates[:, 2 * H:])
        h_new = update * newval + (1.0 - update) * h
        outs.append(h_new)
        cur = h_new
    return jnp.concatenate(outs, axis=-1).astype(state.dtype)


if __name__ == "__main__":
    INPUT_SIZE = 48
    HIDDEN_SIZE = 256     # layer_size = 128 per layer (lane-aligned gates)
    NUM_LAYERS = 2
    BATCH = 2

    key = jax.random.PRNGKey(0)
    kp, kx, ks = jax.random.split(key, 3)

    params = init_gru_stack_params(kp, INPUT_SIZE, HIDDEN_SIZE, NUM_LAYERS)
    x = jax.random.normal(kx, (BATCH, INPUT_SIZE), jnp.float32)
    state = jax.random.normal(ks, (BATCH, HIDDEN_SIZE), jnp.float32)

    out = gru_cell_stack_forward(params, x, state, NUM_LAYERS)
    out = jax.block_until_ready(out)

    ref = _reference_forward(params, x, state, NUM_LAYERS)
    assert out.shape == (BATCH, HIDDEN_SIZE)
    err = jnp.max(jnp.abs(out - ref))
    assert jnp.allclose(out, ref, atol=3e-3, rtol=3e-3), \
        f"mismatch vs reference (max abs err {err})"

    print("KERNEL_OK")
</pallas_src>

<mosaic_0001>
module attributes {stable_mosaic.version = 11 : i64} {
  func.func @_gru_stack_kernel(%arg0: i32, %arg1: memref<8x128xf32, #tpu.memory_space<vmem>>, %arg2: memref<8x256xf32, #tpu.memory_space<vmem>>, %arg3: memref<256x384xbf16, #tpu.memory_space<vmem>>, %arg4: memref<1x256x384xbf16, #tpu.memory_space<vmem>>, %arg5: memref<2x1x384xf32, #tpu.memory_space<vmem>>, %arg6: memref<2x1x384xf32, #tpu.memory_space<vmem>>, %arg7: memref<8x256xf32, #tpu.memory_space<vmem>>, %arg8: memref<8x256xbf16, #tpu.memory_space<vmem>>) attributes {dimension_semantics = [#tpu.dimension_semantics<parallel>], iteration_bounds = array<i64: 1>, scalar_prefetch = 0 : i64, scratch_operands = 1 : i64, tpu.core_type = #tpu.core_type<tc>, window_params = [{transform_indices = @transform_0, window_bounds = array<i64: 8, 128>}, {transform_indices = @transform_1, window_bounds = array<i64: 8, 256>}, {pipeline_mode = #tpu.pipeline_mode<synchronous>, transform_indices = @transform_2, window_bounds = array<i64: 256, 384>}, {pipeline_mode = #tpu.pipeline_mode<synchronous>, transform_indices = @transform_3, window_bounds = array<i64: 1, 256, 384>}, {pipeline_mode = #tpu.pipeline_mode<synchronous>, transform_indices = @transform_4, window_bounds = array<i64: 2, 1, 384>}, {pipeline_mode = #tpu.pipeline_mode<synchronous>, transform_indices = @transform_5, window_bounds = array<i64: 2, 1, 384>}, {transform_indices = @transform_6, window_bounds = array<i64: 8, 256>}]} {
    %c0 = arith.constant 0 : index
    %c0_0 = arith.constant 0 : index
    %c0_1 = arith.constant 0 : index
    %0 = vector.load %arg5[%c0, %c0_0, %c0_1] : memref<2x1x384xf32, #tpu.memory_space<vmem>>, vector<2x1x384xf32>
    %c0_2 = arith.constant 0 : index
    %c0_3 = arith.constant 0 : index
    %c0_4 = arith.constant 0 : index
    %1 = vector.load %arg6[%c0_2, %c0_3, %c0_4] : memref<2x1x384xf32, #tpu.memory_space<vmem>>, vector<2x1x384xf32>
    %c0_5 = arith.constant 0 : index
    %c0_6 = arith.constant 0 : index
    %2 = vector.load %arg1[%c0_5, %c0_6] : memref<8x128xf32, #tpu.memory_space<vmem>>, vector<8x128xf32>
    %3 = arith.truncf %2 : vector<8x128xf32> to vector<8x128xbf16>
    %c0_7 = arith.constant 0 : index
    %c0_8 = arith.constant 0 : index
    %4 = vector.load %arg8[%c0_7, %c0_8] : memref<8x256xbf16, #tpu.memory_space<vmem>>, vector<8x128xbf16>
    tpu.vector_store %arg8[%c0_7, %c0_8], %3 {strides = array<i32>} : memref<8x256xbf16, #tpu.memory_space<vmem>>, vector<8x128xbf16>,
    %c0_9 = arith.constant 0 : index
    %c0_10 = arith.constant 0 : index
    %5 = vector.load %arg2[%c0_9, %c0_10] : memref<8x256xf32, #tpu.memory_space<vmem>>, vector<8x128xf32>
    %6 = arith.truncf %5 : vector<8x128xf32> to vector<8x128xbf16>
    %c0_11 = arith.constant 0 : index
    %c128 = arith.constant 128 : index
    %7 = vector.load %arg8[%c0_11, %c128] : memref<8x256xbf16, #tpu.memory_space<vmem>>, vector<8x128xbf16>
    tpu.vector_store %arg8[%c0_11, %c128], %6 {strides = array<i32>} : memref<8x256xbf16, #tpu.memory_space<vmem>>, vector<8x128xbf16>,
    %c0_12 = arith.constant 0 : index
    %c0_13 = arith.constant 0 : index
    %8 = vector.load %arg2[%c0_12, %c0_13] : memref<8x256xf32, #tpu.memory_space<vmem>>, vector<8x128xf32>
    %c0_14 = arith.constant 0 : index
    %c0_15 = arith.constant 0 : index
    %9 = vector.load %arg8[%c0_14, %c0_15] : memref<8x256xbf16, #tpu.memory_space<vmem>>, vector<8x256xbf16>
    %c0_16 = arith.constant 0 : index
    %c0_17 = arith.constant 0 : index
    %10 = vector.load %arg3[%c0_16, %c0_17] : memref<256x384xbf16, #tpu.memory_space<vmem>>, vector<256x384xbf16>
    %cst = arith.constant dense<0.000000e+00> : vector<8x384xf32>
    %11 = tpu.matmul %9, %10, %cst {dimension_numbers = #tpu.dot_dimension_numbers<[1], [0], [0], [1], [0, 0, 1, 1], [], []>} : vector<8x256xbf16>, vector<256x384xbf16>, vector<8x384xf32> -> vector<8x384xf32>
    %cst_18 = arith.constant dense<0.000000e+00> : vector<8xf32>
    %12 = vector.multi_reduction <add>, %11, %cst_18 [1] : vector<8x384xf32> to vector<8xf32>
    %13 = vector.shape_cast %12 : vector<8xf32> to vector<8x1xf32>
    %cst_19 = arith.constant 0.00260416674 : f32
    %14 = vector.broadcast %cst_19 : f32 to vector<8x1xf32>
    %15 = arith.mulf %13, %14 : vector<8x1xf32>
    %16 = arith.mulf %11, %11 : vector<8x384xf32>
    %cst_20 = arith.constant dense<0.000000e+00> : vector<8xf32>
    %17 = vector.multi_reduction <add>, %16, %cst_20 [1] : vector<8x384xf32> to vector<8xf32>
    %18 = vector.shape_cast %17 : vector<8xf32> to vector<8x1xf32>
    %cst_21 = arith.constant 0.00260416674 : f32
    %19 = vector.broadcast %cst_21 : f32 to vector<8x1xf32>
    %20 = arith.mulf %18, %19 : vector<8x1xf32>
    %21 = arith.mulf %15, %15 : vector<8x1xf32>
    %22 = arith.subf %20, %21 : vector<8x1xf32>
    %23 = vector.broadcast %15 : vector<8x1xf32> to vector<8x384xf32>
    %24 = arith.subf %11, %23 : vector<8x384xf32>
    %cst_22 = arith.constant 1.000000e-03 : f32
    %25 = vector.broadcast %cst_22 : f32 to vector<8x1xf32>
    %26 = arith.addf %22, %25 : vector<8x1xf32>
    %27 = math.rsqrt %26 : vector<8x1xf32>
    %28 = vector.broadcast %27 : vector<8x1xf32> to vector<8x384xf32>
    %29 = arith.mulf %24, %28 : vector<8x384xf32>
    %30 = vector.extract_strided_slice %0 {offsets = [0, 0, 0], sizes = [1, 1, 384], strides = [1, 1, 1]} : vector<2x1x384xf32> to vector<1x1x384xf32>
    %31 = vector.shape_cast %30 : vector<1x1x384xf32> to vector<1x384xf32>
    %32 = vector.broadcast %31 : vector<1x384xf32> to vector<8x384xf32>
    %33 = arith.mulf %29, %32 : vector<8x384xf32>
    %34 = vector.extract_strided_slice %1 {offsets = [0, 0, 0], sizes = [1, 1, 384], strides = [1, 1, 1]} : vector<2x1x384xf32> to vector<1x1x384xf32>
    %35 = vector.shape_cast %34 : vector<1x1x384xf32> to vector<1x384xf32>
    %36 = vector.broadcast %35 : vector<1x384xf32> to vector<8x384xf32>
    %37 = arith.addf %33, %36 : vector<8x384xf32>
    %38 = vector.extract_strided_slice %37 {offsets = [0, 0], sizes = [8, 128], strides = [1, 1]} : vector<8x384xf32> to vector<8x128xf32>
    %39 = arith.negf %38 : vector<8x128xf32>
    %40 = math.exp %39 : vector<8x128xf32>
    %cst_23 = arith.constant 1.000000e+00 : f32
    %41 = vector.broadcast %cst_23 : f32 to vector<8x128xf32>
    %42 = arith.addf %41, %40 : vector<8x128xf32>
    %43 = arith.divf %41, %42 : vector<8x128xf32>
    %44 = vector.extract_strided_slice %37 {offsets = [0, 128], sizes = [8, 128], strides = [1, 1]} : vector<8x384xf32> to vector<8x128xf32>
    %cst_24 = arith.constant 1.000000e+00 : f32
    %45 = vector.broadcast %cst_24 : f32 to vector<8x128xf32>
    %46 = arith.subf %44, %45 : vector<8x128xf32>
    %47 = arith.negf %46 : vector<8x128xf32>
    %48 = math.exp %47 : vector<8x128xf32>
    %cst_25 = arith.constant 1.000000e+00 : f32
    %49 = vector.broadcast %cst_25 : f32 to vector<8x128xf32>
    %50 = arith.addf %49, %48 : vector<8x128xf32>
    %51 = arith.divf %49, %50 : vector<8x128xf32>
    %52 = vector.extract_strided_slice %37 {offsets = [0, 256], sizes = [8, 128], strides = [1, 1]} : vector<8x384xf32> to vector<8x128xf32>
    %53 = arith.mulf %43, %52 : vector<8x128xf32>
    %54 = math.tanh %53 : vector<8x128xf32>
    %55 = arith.subf %54, %8 : vector<8x128xf32>
    %56 = arith.mulf %51, %55 : vector<8x128xf32>
    %57 = arith.addf %8, %56 : vector<8x128xf32>
    %c0_26 = arith.constant 0 : index
    %c0_27 = arith.constant 0 : index
    %58 = vector.load %arg7[%c0_26, %c0_27] : memref<8x256xf32, #tpu.memory_space<vmem>>, vector<8x128xf32>
    tpu.vector_store %arg7[%c0_26, %c0_27], %57 {strides = array<i32>} : memref<8x256xf32, #tpu.memory_space<vmem>>, vector<8x128xf32>,
    %59 = arith.truncf %57 : vector<8x128xf32> to vector<8x128xbf16>
    %c0_28 = arith.constant 0 : index
    %c0_29 = arith.constant 0 : index
    %60 = vector.load %arg8[%c0_28, %c0_29] : memref<8x256xbf16, #tpu.memory_space<vmem>>, vector<8x128xbf16>
    tpu.vector_store %arg8[%c0_28, %c0_29], %59 {strides = array<i32>} : memref<8x256xbf16, #tpu.memory_space<vmem>>, vector<8x128xbf16>,
    %c0_30 = arith.constant 0 : index
    %c128_31 = arith.constant 128 : index
    %61 = vector.load %arg2[%c0_30, %c128_31] : memref<8x256xf32, #tpu.memory_space<vmem>>, vector<8x128xf32>
    %62 = arith.truncf %61 : vector<8x128xf32> to vector<8x128xbf16>
    %c0_32 = arith.constant 0 : index
    %c128_33 = arith.constant 128 : index
    %63 = vector.load %arg8[%c0_32, %c128_33] : memref<8x256xbf16, #tpu.memory_space<vmem>>, vector<8x128xbf16>
    tpu.vector_store %arg8[%c0_32, %c128_33], %62 {strides = array<i32>} : memref<8x256xbf16, #tpu.memory_space<vmem>>, vector<8x128xbf16>,
    %c0_34 = arith.constant 0 : index
    %c128_35 = arith.constant 128 : index
    %64 = vector.load %arg2[%c0_34, %c128_35] : memref<8x256xf32, #tpu.memory_space<vmem>>, vector<8x128xf32>
    %c0_36 = arith.constant 0 : index
    %c0_37 = arith.constant 0 : index
    %65 = vector.load %arg8[%c0_36, %c0_37] : memref<8x256xbf16, #tpu.memory_space<vmem>>, vector<8x256xbf16>
    %c0_38 = arith.constant 0 : index
    %c0_39 = arith.constant 0 : index
    %c0_40 = arith.constant 0 : index
    %66 = vector.load %arg4[%c0_38, %c0_39, %c0_40] : memref<1x256x384xbf16, #tpu.memory_space<vmem>>, vector<1x256x384xbf16>
    %67 = vector.shape_cast %66 : vector<1x256x384xbf16> to vector<256x384xbf16>
    %cst_41 = arith.constant dense<0.000000e+00> : vector<8x384xf32>
    %68 = tpu.matmul %65, %67, %cst_41 {dimension_numbers = #tpu.dot_dimension_numbers<[1], [0], [0], [1], [0, 0, 1, 1], [], []>} : vector<8x256xbf16>, vector<256x384xbf16>, vector<8x384xf32> -> vector<8x384xf32>
    %cst_42 = arith.constant dense<0.000000e+00> : vector<8xf32>
    %69 = vector.multi_reduction <add>, %68, %cst_42 [1] : vector<8x384xf32> to vector<8xf32>
    %70 = vector.shape_cast %69 : vector<8xf32> to vector<8x1xf32>
    %cst_43 = arith.constant 0.00260416674 : f32
    %71 = vector.broadcast %cst_43 : f32 to vector<8x1xf32>
    %72 = arith.mulf %70, %71 : vector<8x1xf32>
    %73 = arith.mulf %68, %68 : vector<8x384xf32>
    %cst_44 = arith.constant dense<0.000000e+00> : vector<8xf32>
    %74 = vector.multi_reduction <add>, %73, %cst_44 [1] : vector<8x384xf32> to vector<8xf32>
    %75 = vector.shape_cast %74 : vector<8xf32> to vector<8x1xf32>
    %cst_45 = arith.constant 0.00260416674 : f32
    %76 = vector.broadcast %cst_45 : f32 to vector<8x1xf32>
    %77 = arith.mulf %75, %76 : vector<8x1xf32>
    %78 = arith.mulf %72, %72 : vector<8x1xf32>
    %79 = arith.subf %77, %78 : vector<8x1xf32>
    %80 = vector.broadcast %72 : vector<8x1xf32> to vector<8x384xf32>
    %81 = arith.subf %68, %80 : vector<8x384xf32>
    %cst_46 = arith.constant 1.000000e-03 : f32
    %82 = vector.broadcast %cst_46 : f32 to vector<8x1xf32>
    %83 = arith.addf %79, %82 : vector<8x1xf32>
    %84 = math.rsqrt %83 : vector<8x1xf32>
    %85 = vector.broadcast %84 : vector<8x1xf32> to vector<8x384xf32>
    %86 = arith.mulf %81, %85 : vector<8x384xf32>
    %87 = vector.extract_strided_slice %0 {offsets = [1, 0, 0], sizes = [1, 1, 384], strides = [1, 1, 1]} : vector<2x1x384xf32> to vector<1x1x384xf32>
    %88 = vector.shape_cast %87 : vector<1x1x384xf32> to vector<1x384xf32>
    %89 = vector.broadcast %88 : vector<1x384xf32> to vector<8x384xf32>
    %90 = arith.mulf %86, %89 : vector<8x384xf32>
    %91 = vector.extract_strided_slice %1 {offsets = [1, 0, 0], sizes = [1, 1, 384], strides = [1, 1, 1]} : vector<2x1x384xf32> to vector<1x1x384xf32>
    %92 = vector.shape_cast %91 : vector<1x1x384xf32> to vector<1x384xf32>
    %93 = vector.broadcast %92 : vector<1x384xf32> to vector<8x384xf32>
    %94 = arith.addf %90, %93 : vector<8x384xf32>
    %95 = vector.extract_strided_slice %94 {offsets = [0, 0], sizes = [8, 128], strides = [1, 1]} : vector<8x384xf32> to vector<8x128xf32>
    %96 = arith.negf %95 : vector<8x128xf32>
    %97 = math.exp %96 : vector<8x128xf32>
    %cst_47 = arith.constant 1.000000e+00 : f32
    %98 = vector.broadcast %cst_47 : f32 to vector<8x128xf32>
    %99 = arith.addf %98, %97 : vector<8x128xf32>
    %100 = arith.divf %98, %99 : vector<8x128xf32>
    %101 = vector.extract_strided_slice %94 {offsets = [0, 128], sizes = [8, 128], strides = [1, 1]} : vector<8x384xf32> to vector<8x128xf32>
    %cst_48 = arith.constant 1.000000e+00 : f32
    %102 = vector.broadcast %cst_48 : f32 to vector<8x128xf32>
    %103 = arith.subf %101, %102 : vector<8x128xf32>
    %104 = arith.negf %103 : vector<8x128xf32>
    %105 = math.exp %104 : vector<8x128xf32>
    %cst_49 = arith.constant 1.000000e+00 : f32
    %106 = vector.broadcast %cst_49 : f32 to vector<8x128xf32>
    %107 = arith.addf %106, %105 : vector<8x128xf32>
    %108 = arith.divf %106, %107 : vector<8x128xf32>
    %109 = vector.extract_strided_slice %94 {offsets = [0, 256], sizes = [8, 128], strides = [1, 1]} : vector<8x384xf32> to vector<8x128xf32>
    %110 = arith.mulf %100, %109 : vector<8x128xf32>
    %111 = math.tanh %110 : vector<8x128xf32>
    %112 = arith.subf %111, %64 : vector<8x128xf32>
    %113 = arith.mulf %108, %112 : vector<8x128xf32>
    %114 = arith.addf %64, %113 : vector<8x128xf32>
    %c0_50 = arith.constant 0 : index
    %c128_51 = arith.constant 128 : index
    %115 = vector.load %arg7[%c0_50, %c128_51] : memref<8x256xf32, #tpu.memory_space<vmem>>, vector<8x128xf32>
    tpu.vector_store %arg7[%c0_50, %c128_51], %114 {strides = array<i32>} : memref<8x256xf32, #tpu.memory_space<vmem>>, vector<8x128xf32>,
    return
  }
  func.func @transform_0(%arg0: i32) -> (i32, i32) {
    %c0_i32 = arith.constant 0 : i32
    %c0_i32_0 = arith.constant 0 : i32
    return %arg0, %c0_i32 : i32, i32
  }
  func.func @transform_1(%arg0: i32) -> (i32, i32) {
    %c0_i32 = arith.constant 0 : i32
    %c0_i32_0 = arith.constant 0 : i32
    return %arg0, %c0_i32 : i32, i32
  }
  func.func @transform_2(%arg0: i32) -> (i32, i32) {
    %c0_i32 = arith.constant 0 : i32
    %c0_i32_0 = arith.constant 0 : i32
    %c0_i32_1 = arith.constant 0 : i32
    return %c0_i32, %c0_i32_0 : i32, i32
  }
  func.func @transform_3(%arg0: i32) -> (i32, i32, i32) {
    %c0_i32 = arith.constant 0 : i32
    %c0_i32_0 = arith.constant 0 : i32
    %c0_i32_1 = arith.constant 0 : i32
    %c0_i32_2 = arith.constant 0 : i32
    return %c0_i32, %c0_i32_0, %c0_i32_1 : i32, i32, i32
  }
  func.func @transform_4(%arg0: i32) -> (i32, i32, i32) {
    %c0_i32 = arith.constant 0 : i32
    %c0_i32_0 = arith.constant 0 : i32
    %c0_i32_1 = arith.constant 0 : i32
    %c0_i32_2 = arith.constant 0 : i32
    return %c0_i32, %c0_i32_0, %c0_i32_1 : i32, i32, i32
  }
  func.func @transform_5(%arg0: i32) -> (i32, i32, i32) {
    %c0_i32 = arith.constant 0 : i32
    %c0_i32_0 = arith.constant 0 : i32
    %c0_i32_1 = arith.constant 0 : i32
    %c0_i32_2 = arith.constant 0 : i32
    return %c0_i32, %c0_i32_0, %c0_i32_1 : i32, i32, i32
  }
  func.func @transform_6(%arg0: i32) -> (i32, i32) {
    %c0_i32 = arith.constant 0 : i32
    %c0_i32_0 = arith.constant 0 : i32
    return %arg0, %c0_i32 : i32, i32
  }
}

</mosaic_0001>

<bundles_post_ra>
// kernel: tpu_custom_call.1
= control target key start
LH: loop header
LB: loop body
LE: loop exit
PB: predicated region body
PF: predicated region fallthrough
CT: control target
= control target key end

     0   :  { %11 = vsyncpa [#allocation4], 0  ;;  %s2013_s0 = inlined_call_operand.hbm [shape: f32[8,128], index: 0, kind: input, shape index: {}]   ;;  %s2014_s1 = inlined_call_operand.hbm [shape: f32[8,256], index: 1, kind: input, shape index: {}]   ;;  %s2015_s2 = inlined_call_operand.hbm [shape: bf16[256,384], index: 2, kind: input, shape index: {}]   ;;  %s2016_s3 = inlined_call_operand.hbm [shape: bf16[1,256,384], index: 3, kind: input, shape index: {}]   ;;  %s2017_s4 = inlined_call_operand.hbm [shape: f32[2,1,384], index: 4, kind: input, shape index: {}]   ;;  %s2018_s5 = inlined_call_operand.hbm [shape: f32[2,1,384], index: 5, kind: input, shape index: {}]   ;;  %s2019_s6 = inlined_call_operand.hbm [shape: f32[8,256], index: 6, kind: output, shape index: {}]  }
   0x1   :  { %12 = vsyncpa [#allocation7], 0 }
   0x2   :  { %13 = vsyncpa [#allocation10], 0 }
   0x3   :  { %14 = vsyncpa [#allocation13], 0  ;;  %s32_s23 = sshll.u32 %s2014_s1, 4  ;;  %s33_s23 = int_to_ptr.hbm [resolvable:$true] %s32_s23 }
   0x4   :  { %15 = vsyncpa [#allocation5], 0  ;;  %s1866_s24 = smov [#allocation6]   ;;  %s55_s28 = sshll.u32 %s2016_s3, 4  ;;  %s56_s28 = int_to_ptr.hbm [resolvable:$true] %s55_s28 }
   0x5   :  { %s34_s25 = sshll.u32 %s1866_s24, 4  ;;  %s1867_s29 = smov [#allocation9]   ;;  %s35_s25 = int_to_ptr.vmem [resolvable:$true] %s34_s25 }
   0x6   :  { %37 = dma.hbm_to_vmem [thread:$0]  %s33_s23, 256, %s35_s25, [#allocation7]  }
   0x7   :  { %s57_s30 = sshll.u32 %s1867_s29, 4  ;;  %s21_s9 = sshll.u32 %s2013_s0, 4  ;;  %s58_s30 = int_to_ptr.vmem [resolvable:$true] %s57_s30  ;;  %s22_s9 = int_to_ptr.hbm [resolvable:$true] %s21_s9 }
   0x8   :  { %s1868_s1 = smov 192   ;;  %s1869_s10 = smov 12  }
   0x9   :  { %63 = dma.hbm_to_vmem [thread:$0]  %s56_s28, 6144, %s58_s30, [#allocation10], %s1868_s1, %s1868_s1, %s1869_s10  }
   0xa   :  { %s42_s13 = sshll.u32 %s2015_s2, 4  ;;  %s1870_s14 = smov [#allocation3]   ;;  %s43_s13 = int_to_ptr.hbm [resolvable:$true] %s42_s13 }
   0xb   :  { %s23_s15 = sshll.u32 %s1870_s14, 4  ;;  %s1871_s3 = smov [#allocation8]   ;;  %s24_s15 = int_to_ptr.vmem [resolvable:$true] %s23_s15 }
   0xc   :  { %26 = dma.hbm_to_vmem [thread:$0]  %s22_s9, 128, %s24_s15, [#allocation4]  }
   0xd   :  { %s44_s16 = sshll.u32 %s1871_s3, 4  ;;  %s68_s0 = sshll.u32 %s2017_s4, 4  ;;  %s45_s16 = int_to_ptr.vmem [resolvable:$true] %s44_s16  ;;  %s69_s0 = int_to_ptr.hbm [resolvable:$true] %s68_s0 }
   0xe   :  { %50 = dma.hbm_to_vmem [thread:$0]  %s43_s13, 6144, %s45_s16, [#allocation7], %s1868_s1, %s1868_s1, %s1869_s10  }
   0xf   :  { %s1872_s19 = smov [#allocation11]   ;;  %s81_s2 = sshll.u32 %s2018_s5, 4  ;;  %s82_s2 = int_to_ptr.hbm [resolvable:$true] %s81_s2 }
  0x10   :  { %s70_s20 = sshll.u32 %s1872_s19, 4  ;;  %s1873_s23 = smov 48   ;;  %s71_s20 = int_to_ptr.vmem [resolvable:$true] %s70_s20 }
  0x11   :  { %s1874_s24 = smov 3   ;;  %s1875_s25 = smov [#allocation12]  }
  0x12   :  { %76 = dma.hbm_to_vmem [thread:$0]  %s69_s0, 96, %s71_s20, [#allocation10], %s1873_s23, %s1873_s23, %s1874_s24  }
  0x13   :  { %s83_s26 = sshll.u32 %s1875_s25, 4  ;;  %s84_s26 = int_to_ptr.vmem [resolvable:$true] %s83_s26 }
  0x14   :  { %89 = dma.hbm_to_vmem [thread:$0]  %s82_s2, 96, %s84_s26, [#allocation13], %s1873_s23, %s1873_s23, %s1874_s24  }
  0x15   :  { %1856 = dma.done.wait [#allocation4], 128  }
  0x16   :  { %1857 = vsyncadd [#allocation4], 4294967168 }
  0x17   :  { %1858 = dma.done.wait [#allocation7], 6400  }
  0x18   :  { %1859 = vsyncadd [#allocation7], 4294960896 }
  0x19   :  { %1860 = dma.done.wait [#allocation10], 6240  }
  0x1a   :  { %1861 = vsyncadd [#allocation10], 4294961056 }
  0x1b   :  { %1862 = dma.done.wait [#allocation13], 96  }
  0x1c   :  { %1863 = vsyncadd [#allocation13], 4294967200  ;;  %v1243_v0 = vld [vmem:[#allocation8 + $0xa8] sm:$0xf]  ;;  %v1569_v1 = vld [vmem:[#allocation8 + $0xb0] sm:$0xf0] }
  0x1d   :  { %v1339_v2 = vld [vmem:[#allocation8 + $0x168] sm:$0xf]  ;;  %v1244_v3 = vor.u32 %v1569_v1, %v1243_v0  ;;  %v1593_v4 = vld [vmem:[#allocation8 + $0x170] sm:$0xf0]  ;;  %v1231_v5 = vld [vmem:[#allocation8 + $0x90] sm:$0xf] }
  0x1e   :  { %v1566_v6 = vld [vmem:[#allocation8 + $0x98] sm:$0xf0]  ;;  %v1340_v7 = vor.u32 %v1593_v4, %v1339_v2  ;;  %v1327_v8 = vld [vmem:[#allocation8 + $0x150] sm:$0xf]  ;;  %v1568_v10 = vld [vmem:[#allocation8 + $0xac] sm:$0xf] }
  0x1f   :  { %v1590_v9 = vld [vmem:[#allocation8 + $0x158] sm:$0xf0]  ;;  %453 = vmatpush.bf16.msra.mxu0 %v1244_v3  ;;  %v1232_v11 = vor.u32 %v1566_v6, %v1231_v5  ;;  %v1245_v12 = vld [vmem:[#allocation8 + $0xb4] sm:$0xf0]  ;;  %v1592_v13 = vld [vmem:[#allocation8 + $0x16c] sm:$0xf] }
  0x20   :  { %v1341_v14 = vld [vmem:[#allocation8 + $0x174] sm:$0xf0]  ;;  %466 = vmatpush.bf16.msra.mxu1 %v1340_v7  ;;  %v1328_v15 = vor.u32 %v1590_v9, %v1327_v8  ;;  %v1248_v16 = vor.u32 %v1568_v10, %v1245_v12  ;;  %v1563_v19 = vld [vmem:[#allocation8 + $0x80] sm:$0xf0]  ;;  %v1565_v22 = vld [vmem:[#allocation8 + $0x94] sm:$0xf] }
  0x21   :  { %v1344_v17 = vor.u32 %v1592_v13, %v1341_v14  ;;  %v1219_v18 = vld [vmem:[#allocation8 + $0x78] sm:$0xf]  ;;  %v1587_v21 = vld [vmem:[#allocation8 + $0x140] sm:$0xf0]  ;;  %v1233_v23 = vld [vmem:[#allocation8 + $0x9c] sm:$0xf0] }
  0x22   :  { %v1315_v20 = vld [vmem:[#allocation8 + $0x138] sm:$0xf]  ;;  %479 = vmatpush.bf16.msra.mxu2 %v1248_v16  ;;  %v1236_v24 = vor.u32 %v1565_v22, %v1233_v23  ;;  %v1589_v25 = vld [vmem:[#allocation8 + $0x154] sm:$0xf]  ;;  %v1329_v26 = vld [vmem:[#allocation8 + $0x15c] sm:$0xf0]  ;;  %v1220_v27 = vor.u32 %v1563_v19, %v1219_v18 }
  0x23   :  { %492 = vmatpush.bf16.msra.mxu3 %v1344_v17  ;;  %454 = vmatpush.bf16.msra.mxu0 %v1232_v11  ;;  %v1332_v28 = vor.u32 %v1589_v25, %v1329_v26  ;;  %v1207_v29 = vld [vmem:[#allocation8 + $0x60] sm:$0xf]  ;;  %v1560_v30 = vld [vmem:[#allocation8 + $0x68] sm:$0xf0]  ;;  %v1316_v31 = vor.u32 %v1587_v21, %v1315_v20  ;;  %v1562_v32 = vld [vmem:[#allocation8 + $0x7c] sm:$0xf] }
  0x24   :  { %467 = vmatpush.bf16.msra.mxu1 %v1328_v15  ;;  %v1221_v33 = vld [vmem:[#allocation8 + $0x84] sm:$0xf0]  ;;  %v1586_v34 = vld [vmem:[#allocation8 + $0x13c] sm:$0xf]  ;;  %v1303_v35 = vld [vmem:[#allocation8 + $0x120] sm:$0xf]  ;;  %v1208_v41 = vor.u32 %v1560_v30, %v1207_v29 }
  0x25   :  { %v1584_v36 = vld [vmem:[#allocation8 + $0x128] sm:$0xf0]  ;;  %v1317_v37 = vld [vmem:[#allocation8 + $0x144] sm:$0xf0]  ;;  %v1224_v38 = vor.u32 %v1562_v32, %v1221_v33  ;;  %v1559_v40 = vld [vmem:[#allocation8 + $0x64] sm:$0xf] }
  0x26   :  { %480 = vmatpush.bf16.msra.mxu2 %v1236_v24  ;;  %v1320_v39 = vor.u32 %v1586_v34, %v1317_v37  ;;  %v1209_v42 = vld [vmem:[#allocation8 + $0x6c] sm:$0xf0]  ;;  %v1583_v43 = vld [vmem:[#allocation8 + $0x124] sm:$0xf]  ;;  %v1304_v45 = vor.u32 %v1584_v36, %v1303_v35  ;;  %v1195_v46 = vld [vmem:[#allocation8 + $0x48] sm:$0xf] }
  0x27   :  { %493 = vmatpush.bf16.msra.mxu3 %v1332_v28  ;;  %455 = vmatpush.bf16.msra.mxu0 %v1220_v27  ;;  %v1305_v44 = vld [vmem:[#allocation8 + $0x12c] sm:$0xf0]  ;;  %v1557_v47 = vld [vmem:[#allocation8 + $0x50] sm:$0xf0]  ;;  %v1291_v48 = vld [vmem:[#allocation8 + $0x108] sm:$0xf]  ;;  %v1212_v50 = vor.u32 %v1559_v40, %v1209_v42 }
  0x28   :  { %468 = vmatpush.bf16.msra.mxu1 %v1316_v31  ;;  %v1581_v49 = vld [vmem:[#allocation8 + $0x110] sm:$0xf0]  ;;  %v1308_v51 = vor.u32 %v1583_v43, %v1305_v44  ;;  %v1556_v52 = vld [vmem:[#allocation8 + $0x4c] sm:$0xf]  ;;  %v1196_v53 = vor.u32 %v1557_v47, %v1195_v46  ;;  %v1197_v54 = vld [vmem:[#allocation8 + $0x54] sm:$0xf0] }
  0x29   :  { %v1580_v55 = vld [vmem:[#allocation8 + $0x10c] sm:$0xf]  ;;  %v1293_v56 = vld [vmem:[#allocation8 + $0x114] sm:$0xf0]  ;;  %v1292_v57 = vor.u32 %v1581_v49, %v1291_v48  ;;  %v1183_v58 = vld [vmem:[#allocation8 + $0x30] sm:$0xf]  ;;  %v1200_v62 = vor.u32 %v1556_v52, %v1197_v54 }
  0x2a   :  { %481 = vmatpush.bf16.msra.mxu2 %v1224_v38  ;;  %v1554_v59 = vld [vmem:[#allocation8 + $0x38] sm:$0xf0]  ;;  %v1279_v60 = vld [vmem:[#allocation8 + $0xf0] sm:$0xf]  ;;  %v1296_v63 = vor.u32 %v1580_v55, %v1293_v56  ;;  %v1553_v0 = vld [vmem:[#allocation8 + $0x34] sm:$0xf] }
  0x2b   :  { %494 = vmatpush.bf16.msra.mxu3 %v1320_v39  ;;  %456 = vmatpush.bf16.msra.mxu0 %v1208_v41  ;;  %v1578_v61 = vld [vmem:[#allocation8 + $0xf8] sm:$0xf0]  ;;  %v1184_v1 = vor.u32 %v1554_v59, %v1183_v58  ;;  %v1185_v2 = vld [vmem:[#allocation8 + $0x3c] sm:$0xf0]  ;;  %v1577_v3 = vld [vmem:[#allocation8 + $0xf4] sm:$0xf] }
  0x2c   :  { %469 = vmatpush.bf16.msra.mxu1 %v1304_v45  ;;  %v1281_v4 = vld [vmem:[#allocation8 + $0xfc] sm:$0xf0]  ;;  %v1280_v5 = vor.u32 %v1578_v61, %v1279_v60  ;;  %v1171_v6 = vld [vmem:[#allocation8 + $0x18] sm:$0xf]  ;;  %v1551_v7 = vld [vmem:[#allocation8 + $0x20] sm:$0xf0]  ;;  %v1188_v10 = vor.u32 %v1553_v0, %v1185_v2 }
  0x2d   :  { %v1267_v8 = vld [vmem:[#allocation8 + $0xd8] sm:$0xf]  ;;  %v1575_v9 = vld [vmem:[#allocation8 + $0xe0] sm:$0xf0]  ;;  %v1284_v11 = vor.u32 %v1577_v3, %v1281_v4  ;;  %v1159_v12 = vld [vmem:[#allocation8] sm:$0xf]  ;;  %v1172_v15 = vor.u32 %v1551_v7, %v1171_v6 }
  0x2e   :  { %482 = vmatpush.bf16.msra.mxu2 %v1212_v50  ;;  %v1548_v13 = vld [vmem:[#allocation8 + $0x8] sm:$0xf0]  ;;  %v1550_v14 = vld [vmem:[#allocation8 + $0x1c] sm:$0xf]  ;;  %v1173_v16 = vld [vmem:[#allocation8 + $0x24] sm:$0xf0]  ;;  %v1268_v19 = vor.u32 %v1575_v9, %v1267_v8 }
  0x2f   :  { %495 = vmatpush.bf16.msra.mxu3 %v1308_v51  ;;  %457 = vmatpush.bf16.msra.mxu0 %v1196_v53  ;;  %v1574_v17 = vld [vmem:[#allocation8 + $0xdc] sm:$0xf]  ;;  %v1269_v18 = vld [vmem:[#allocation8 + $0xe4] sm:$0xf0]  ;;  %v1255_v20 = vld [vmem:[#allocation8 + $0xc0] sm:$0xf]  ;;  %v1176_v29 = vor.u32 %v1550_v14, %v1173_v16  ;;  %v1160_v32 = vor.u32 %v1548_v13, %v1159_v12 }
  0x30   :  { %470 = vmatpush.bf16.msra.mxu1 %v1292_v57  ;;  %v118_v21 = vld [vmem:[#allocation3] sm:$0xff]  ;;  %v1930_v22 = vld [vmem:[#allocation6] sm:$0xff]  ;;  %v1570_v25 = vld [vmem:[#allocation8 + $0xb8] sm:$0xf0]  ;;  %v1272_v30 = vor.u32 %v1574_v17, %v1269_v18  ;;  %s1876_s4 = smov [#allocation14]   ;;  %s1144_s29 = sshll.u32 %s2019_s6, 4  ;;  %s1145_s29 = int_to_ptr.hbm [resolvable:$true] %s1144_s29 }
  0x31   :  { %v1572_v23 = vld [vmem:[#allocation8 + $0xc8] sm:$0xf0]  ;;  %v1251_v24 = vld [vmem:[#allocation8 + $0xb0] sm:$0xf]  ;;  %v1646_v26 = vpack.c.bf16 %v1930_v22, %v118_v21  ;;  %v1594_v28 = vld [vmem:[#allocation8 + $0x178] sm:$0xf0] }
  0x32   :  { %483 = vmatpush.bf16.msra.mxu2 %v1200_v62  ;;  %v1347_v27 = vld [vmem:[#allocation8 + $0x170] sm:$0xf]  ;;  %v1547_v31 = vld [vmem:[#allocation8 + $0x4] sm:$0xf]  ;;  %v1256_v38 = vor.u32 %v1572_v23, %v1255_v20  ;;  %v1252_v39 = vor.u32 %v1570_v25, %v1251_v24  ;;  %v1239_v41 = vld [vmem:[#allocation8 + $0x98] sm:$0xf] }
  0x33   :  { %496 = vmatpush.bf16.msra.mxu3 %v1296_v63  ;;  %458 = vmatpush.bf16.msra.mxu0 %v1184_v1  ;;  %v1161_v33 = vld [vmem:[#allocation8 + $0xc] sm:$0xf0]  ;;  %v1571_v34 = vld [vmem:[#allocation8 + $0xc4] sm:$0xf]  ;;  %v191_v36 = vunpack.c.l.b16 %v1646_v26  ;;  %v192_v37 = vunpack.c.h.b16 %v1646_v26  ;;  %v1348_v40 = vor.u32 %v1594_v28, %v1347_v27  ;;  %v1335_v43 = vld [vmem:[#allocation8 + $0x158] sm:$0xf] }
  0x34   :  { %471 = vmatpush.bf16.msra.mxu1 %v1280_v5  ;;  %v1257_v35 = vld [vmem:[#allocation8 + $0xcc] sm:$0xf0]  ;;  %v1567_v42 = vld [vmem:[#allocation8 + $0xa0] sm:$0xf0]  ;;  %v1164_v45 = vor.u32 %v1547_v31, %v1161_v33  ;;  %v1227_v51 = vld [vmem:[#allocation8 + $0x80] sm:$0xf] }
  0x35   :  { %v1591_v44 = vld [vmem:[#allocation8 + $0x160] sm:$0xf0]  ;;  %v1260_v46 = vor.u32 %v1571_v34, %v1257_v35  ;;  %v193_v47 = vpack.c.b16 %v191_v36, %v191_v36  ;;  %v194_v48 = vpack.c.b16 %v192_v37, %v192_v37  ;;  %v1240_v49 = vor.u32 %v1567_v42, %v1239_v41  ;;  %v1564_v52 = vld [vmem:[#allocation8 + $0x88] sm:$0xf0]  ;;  %v1323_v53 = vld [vmem:[#allocation8 + $0x140] sm:$0xf] }
  0x36   :  { %484 = vmatpush.bf16.msra.mxu2 %v1188_v10  ;;  %v1336_v50 = vor.u32 %v1591_v44, %v1335_v43  ;;  %v1588_v54 = vld [vmem:[#allocation8 + $0x148] sm:$0xf0]  ;;  %v1228_v55 = vor.u32 %v1564_v52, %v1227_v51  ;;  %v1215_v57 = vld [vmem:[#allocation8 + $0x68] sm:$0xf]  ;;  %v1561_v58 = vld [vmem:[#allocation8 + $0x70] sm:$0xf0] }
  0x37   :  { %497 = vmatpush.bf16.msra.mxu3 %v1284_v11  ;;  %459 = vmatpush.bf16.msra.mxu0 %v1172_v15  ;;  %v1324_v56 = vor.u32 %v1588_v54, %v1323_v53  ;;  %v1311_v59 = vld [vmem:[#allocation8 + $0x128] sm:$0xf]  ;;  %v1585_v60 = vld [vmem:[#allocation8 + $0x130] sm:$0xf0]  ;;  %v1216_v61 = vor.u32 %v1561_v58, %v1215_v57  ;;  %v1203_v63 = vld [vmem:[#allocation8 + $0x50] sm:$0xf] }
  0x38   :  { %472 = vmatpush.bf16.msra.mxu1 %v1268_v19  ;;  %v1312_v62 = vor.u32 %v1585_v60, %v1311_v59  ;;  %v1558_v0 = vld [vmem:[#allocation8 + $0x58] sm:$0xf0]  ;;  %v1299_v1 = vld [vmem:[#allocation8 + $0x110] sm:$0xf]  ;;  %v1191_v5 = vld [vmem:[#allocation8 + $0x38] sm:$0xf] }
  0x39   :  { %v1582_v2 = vld [vmem:[#allocation8 + $0x118] sm:$0xf0]  ;;  %v1204_v3 = vor.u32 %v1558_v0, %v1203_v63  ;;  %v1555_v6 = vld [vmem:[#allocation8 + $0x40] sm:$0xf0]  ;;  %v1287_v7 = vld [vmem:[#allocation8 + $0xf8] sm:$0xf] }
  0x3a   :  { %485 = vmatpush.bf16.msra.mxu2 %v1176_v29  ;;  %v1300_v4 = vor.u32 %v1582_v2, %v1299_v1  ;;  %v1579_v8 = vld [vmem:[#allocation8 + $0x100] sm:$0xf0]  ;;  %v1192_v9 = vor.u32 %v1555_v6, %v1191_v5  ;;  %v1179_v11 = vld [vmem:[#allocation8 + $0x20] sm:$0xf]  ;;  %v1552_v12 = vld [vmem:[#allocation8 + $0x28] sm:$0xf0] }
  0x3b   :  { %498 = vmatpush.bf16.msra.mxu3 %v1272_v30  ;;  %460 = vmatpush.bf16.msra.mxu0 %v1160_v32  ;;  %v1288_v10 = vor.u32 %v1579_v8, %v1287_v7  ;;  %v1275_v13 = vld [vmem:[#allocation8 + $0xe0] sm:$0xf]  ;;  %v1576_v14 = vld [vmem:[#allocation8 + $0xe8] sm:$0xf0]  ;;  %v1180_v15 = vor.u32 %v1552_v12, %v1179_v11  ;;  %v1167_v17 = vld [vmem:[#allocation8 + $0x8] sm:$0xf] }
  0x3c   :  { %473 = vmatpush.bf16.msra.mxu1 %v1256_v38  ;;  %v1276_v16 = vor.u32 %v1576_v14, %v1275_v13  ;;  %v1549_v18 = vld [vmem:[#allocation8 + $0x10] sm:$0xf0]  ;;  %v1263_v19 = vld [vmem:[#allocation8 + $0xc8] sm:$0xf]  ;;  %v1426_v59 = vld [vmem:[#allocation9 + $0x90] sm:$0xf] }
  0x3d   :  { %v1573_v20 = vld [vmem:[#allocation8 + $0xd0] sm:$0xf0]  ;;  %v1168_v21 = vor.u32 %v1549_v18, %v1167_v17  ;;  %v1438_v51 = vld [vmem:[#allocation9 + $0xa8] sm:$0xf]  ;;  %v1614_v60 = vld [vmem:[#allocation9 + $0x98] sm:$0xf0] }
  0x3e   :  { %486 = vmatpush.bf16.msra.mxu2 %v1164_v45  ;;  %461 = vmatmul.bf16.vlgmr.msra.gmra.mxu0 %v193_v47  ;;  %v1264_v23 = vor.u32 %v1573_v20, %v1263_v19  ;;  %v1617_v52 = vld [vmem:[#allocation9 + $0xb0] sm:$0xf0]  ;;  %v1534_v54 = vld [vmem:[#allocation9 + $0x168] sm:$0xf]  ;;  %v1638_v63 = vld [vmem:[#allocation9 + $0x158] sm:$0xf0] }
  0x3f   :  { %505 = vmatpush.bf16.msrb.mxu0 %v1252_v39  ;;  %499 = vmatpush.bf16.msra.mxu3 %v1260_v46  ;;  %v1439_v53 = vor.u32 %v1617_v52, %v1438_v51  ;;  %v1414_v1 = vld [vmem:[#allocation9 + $0x78] sm:$0xf]  ;;  %v1611_v2 = vld [vmem:[#allocation9 + $0x80] sm:$0xf0]  ;;  %v1955_v6 = vld [vmem:[#allocation11] sm:$0x7] }
  0x40   :  { %518 = vmatpush.bf16.msrb.mxu1 %v1348_v40  ;;  %v1635_v5 = vld [vmem:[#allocation9 + $0x140] sm:$0xf0]  ;;  %v1402_v8 = vld [vmem:[#allocation9 + $0x60] sm:$0xf]  ;;  %v1632_v13 = vld [vmem:[#allocation9 + $0x128] sm:$0xf0] }
  0x41   :  { %474 = vmatmul.bf16.vlgmr.msra.gmra.mxu1 %v194_v48  ;;  %487 = vmatmul.bf16.vlgmr.msra.gmra.mxu2 %v193_v47  ;;  %v1616_v14 = vld [vmem:[#allocation9 + $0xac] sm:$0xf]  ;;  %v1536_v20 = vld [vmem:[#allocation9 + $0x174] sm:$0xf0]  ;;  %s1142_s5 = sshll.u32 %s1876_s4, 4  ;;  %s1143_s5 = int_to_ptr.vmem [resolvable:$true] %s1142_s5 }
  0x42   :  { %500 = vmatmul.bf16.vlgmr.msra.gmra.mxu3 %v194_v48  ;;  %962 = vmatpush.bf16.msrb.mxu2 %v1439_v53  ;;  %v1640_v19 = vld [vmem:[#allocation9 + $0x16c] sm:$0xf]  ;;  %v1634_v53 = vld [vmem:[#allocation9 + $0x13c] sm:$0xf] }
  0x43   :  { %506 = vmatpush.bf16.msrb.mxu0 %v1240_v49 }
  0x44   :  { %519 = vmatpush.bf16.msrb.mxu1 %v1336_v50 }
  0x47   :  { %507 = vmatpush.bf16.msrb.mxu0 %v1228_v55  ;;  %v1641_v55 = vld [vmem:[#allocation9 + $0x170] sm:$0xf0] }
  0x48   :  { %520 = vmatpush.bf16.msrb.mxu1 %v1324_v56  ;;  %v1535_v57 = vor.u32 %v1641_v55, %v1534_v54  ;;  %v1512_v54 = vld [vmem:[#allocation9 + $0x144] sm:$0xf0] }
  0x4a   :  { %975 = vmatpush.bf16.msrb.mxu3 %v1535_v57  ;;  %v1366_v57 = vld [vmem:[#allocation9 + $0x18] sm:$0xf] }
  0x4b   :  { %508 = vmatpush.bf16.msrb.mxu0 %v1216_v61  ;;  %v1427_v61 = vor.u32 %v1614_v60, %v1426_v59  ;;  %v1599_v59 = vld [vmem:[#allocation9 + $0x20] sm:$0xf0]  ;;  %v1462_v60 = vld [vmem:[#allocation9 + $0xd8] sm:$0xf] }
  0x4c   :  { %521 = vmatpush.bf16.msrb.mxu1 %v1312_v62  ;;  %v1522_v62 = vld [vmem:[#allocation9 + $0x150] sm:$0xf] }
  0x4d   :  { %v1523_v0 = vor.u32 %v1638_v63, %v1522_v62  ;;  %963 = vmatpush.bf16.msrb.mxu2 %v1427_v61  ;;  %v1623_v63 = vld [vmem:[#allocation9 + $0xe0] sm:$0xf0] }
  0x4f   :  { %509 = vmatpush.bf16.msrb.mxu0 %v1204_v3  ;;  %976 = vmatpush.bf16.msrb.mxu3 %v1523_v0  ;;  %v1510_v3 = vld [vmem:[#allocation9 + $0x138] sm:$0xf]  ;;  %v1607_v0 = vld [vmem:[#allocation9 + $0x64] sm:$0xf] }
  0x50   :  { %522 = vmatpush.bf16.msrb.mxu1 %v1300_v4  ;;  %v1415_v4 = vor.u32 %v1611_v2, %v1414_v1  ;;  %v1511_v7 = vor.u32 %v1635_v5, %v1510_v3  ;;  %v1404_v1 = vld [vmem:[#allocation9 + $0x6c] sm:$0xf0]  ;;  %v1367_v5 = vor.u32 %v1599_v59, %v1366_v57  ;;  %v1622_v57 = vld [vmem:[#allocation9 + $0xdc] sm:$0xf]  ;;  %v1464_v59 = vld [vmem:[#allocation9 + $0xe4] sm:$0xf0] }
  0x52   :  { %964 = vmatpush.bf16.msrb.mxu2 %v1415_v4 }
  0x53   :  { %510 = vmatpush.bf16.msrb.mxu0 %v1192_v9  ;;  %v1608_v9 = vld [vmem:[#allocation9 + $0x68] sm:$0xf0]  ;;  %977 = vmatpush.bf16.msrb.mxu3 %v1511_v7  ;;  %v1631_v7 = vld [vmem:[#allocation9 + $0x124] sm:$0xf] }
  0x54   :  { %523 = vmatpush.bf16.msrb.mxu1 %v1288_v10  ;;  %v1498_v10 = vld [vmem:[#allocation9 + $0x120] sm:$0xf]  ;;  %v1403_v12 = vor.u32 %v1608_v9, %v1402_v8  ;;  %v1407_v9 = vor.u32 %v1607_v0, %v1404_v1  ;;  %v1467_v1 = vor.u32 %v1622_v57, %v1464_v59  ;;  %v1621_v57 = vld [vmem:[#allocation9 + $0xd0] sm:$0xf0] }
  0x55   :  { %v1499_v17 = vor.u32 %v1632_v13, %v1498_v10  ;;  %v1354_v10 = vld [vmem:[#allocation9] sm:$0xf] }
  0x56   :  { %965 = vmatpush.bf16.msrb.mxu2 %v1403_v12  ;;  %v1596_v12 = vld [vmem:[#allocation9 + $0x8] sm:$0xf0] }
  0x57   :  { %511 = vmatpush.bf16.msrb.mxu0 %v1180_v15  ;;  %v1440_v15 = vld [vmem:[#allocation9 + $0xb4] sm:$0xf0]  ;;  %978 = vmatpush.bf16.msrb.mxu3 %v1499_v17  ;;  %v1604_v17 = vld [vmem:[#allocation9 + $0x4c] sm:$0xf] }
  0x58   :  { %524 = vmatpush.bf16.msrb.mxu1 %v1276_v16  ;;  %v1443_v18 = vor.u32 %v1616_v14, %v1440_v15 }
  0x5b   :  { %512 = vmatpush.bf16.msrb.mxu0 %v1168_v21  ;;  %v1390_v21 = vld [vmem:[#allocation9 + $0x48] sm:$0xf] }
  0x5c   :  { %525 = vmatpush.bf16.msrb.mxu1 %v1264_v23  ;;  %v564_v23 = vperm.slane %v1955_v6, 0 }
  0x5e   :  { %513 = vmatmul.bf16.vlgmr.msrb.gmra.mxu0 %v193_v47 }
  0x5f   :  { %526 = vmatmul.bf16.vlgmr.msrb.gmra.mxu1 %v194_v48  ;;  %988 = vmatpush.bf16.msra.mxu0 %v1443_v18  ;;  %v1392_v18 = vld [vmem:[#allocation9 + $0x54] sm:$0xf0] }
  0xbb   :  { %v462_v24 = vpop.f32.mrf.mxu0 }
  0xbe   :  { %v475_v25 = vpop.f32.mrf.mxu1 }
  0xbf   :  { %v1933_v32 = vadd.f32 %v475_v25, %v462_v24  ;;  %v1539_v24 = vor.u32 %v1640_v19, %v1536_v20  ;;  %v1605_v25 = vld [vmem:[#allocation9 + $0x50] sm:$0xf0]  ;;  %v1628_v19 = vld [vmem:[#allocation9 + $0x10c] sm:$0xf]  ;;  %v1446_v20 = vld [vmem:[#allocation9 + $0xb0] sm:$0xf] }
  0xc1   :  { %v536_v39 = vmul.f32 %v1933_v32, %v1933_v32  ;;  %1001 = vmatpush.bf16.msra.mxu1 %v1539_v24 }
  0xc3   :  { %v464_v26 = vpop.f32.mrf.mxu0 }
  0xc4   :  { %v488_v28 = vpop.f32.mrf.mxu2  ;;  %v1486_v26 = vld [vmem:[#allocation9 + $0x108] sm:$0xf] }
  0xc5   :  { %v501_v29 = vpop.f32.mrf.mxu3 }
  0xc6   :  { %v477_v27 = vpop.f32.mrf.mxu1  ;;  %v1935_v33 = vadd.f32 %v501_v29, %v488_v28  ;;  %v1391_v28 = vor.u32 %v1605_v25, %v1390_v21  ;;  %v1629_v29 = vld [vmem:[#allocation9 + $0x110] sm:$0xf0]  ;;  %v1618_v25 = vld [vmem:[#allocation9 + $0xb8] sm:$0xf0] }
  0xc8   :  { %v531_v37 = vadd.f32 %v1935_v33, %v1933_v32  ;;  %v537_v40 = vmul.f32 %v1935_v33, %v1935_v33  ;;  %966 = vmatpush.bf16.msrb.mxu2 %v1391_v28  ;;  %v1355_v28 = vor.u32 %v1596_v12, %v1354_v10  ;;  %v1609_v10 = vld [vmem:[#allocation9 + $0x70] sm:$0xf0]  ;;  %v1506_v12 = vld [vmem:[#allocation9 + $0x128] sm:$0xf] }
  0xca   :  { %v539_v44 = vadd.f32 %v537_v40, %v536_v39  ;;  %v1378_v39 = vld [vmem:[#allocation9 + $0x30] sm:$0xf]  ;;  %v1963_v40 = vld [vmem:[#allocation12] sm:$0x7] }
  0xcb   :  { %v574_v3 = vperm.slane %v1963_v40, 0  ;;  %v575_v4 = vperm.slane %v1963_v40, 1 }
  0xcc   :  { %v490_v30 = vpop.f32.mrf.mxu2 }
  0xcd   :  { %v503_v31 = vpop.f32.mrf.mxu3  ;;  %v1613_v30 = vld [vmem:[#allocation9 + $0x94] sm:$0xf] }
  0xce   :  { %v1428_v31 = vld [vmem:[#allocation9 + $0x9c] sm:$0xf0] }
  0xdb   :  { %v514_v34 = vpop.f32.mrf.mxu0 }
  0xdc   :  { %v527_v35 = vpop.f32.mrf.mxu1 }
  0xdd   :  { %v1937_v36 = vadd.f32 %v527_v35, %v514_v34  ;;  %v1487_v34 = vor.u32 %v1629_v29, %v1486_v26  ;;  %v1431_v35 = vor.u32 %v1613_v30, %v1428_v31  ;;  %v1542_v26 = vld [vmem:[#allocation9 + $0x170] sm:$0xf]  ;;  %v1395_v30 = vor.u32 %v1604_v17, %v1392_v18  ;;  %v1601_v31 = vld [vmem:[#allocation9 + $0x34] sm:$0xf] }
  0xdf   :  { %v532_v38 = vadd.f32 %v531_v37, %v1937_v36  ;;  %v538_v42 = vmul.f32 %v1937_v36, %v1937_v36  ;;  %v1637_v37 = vld [vmem:[#allocation9 + $0x154] sm:$0xf]  ;;  %989 = vmatpush.bf16.msra.mxu0 %v1431_v35  ;;  %979 = vmatpush.bf16.msrb.mxu3 %v1487_v34 }
  0xe1   :  { %533 = vadd.xlane.f32.xlu0 %v532_v38  ;;  %v540_v45 = vadd.f32 %v539_v44, %v538_v42  ;;  %v1524_v38 = vld [vmem:[#allocation9 + $0x15c] sm:$0xf0]  ;;  %v565_v42 = vperm.slane %v1955_v6, 1  ;;  %v1602_v44 = vld [vmem:[#allocation9 + $0x38] sm:$0xf0] }
  0xe2   :  { %v1379_v51 = vor.u32 %v1602_v44, %v1378_v39  ;;  %v1625_v39 = vld [vmem:[#allocation9 + $0xf4] sm:$0xf]  ;;  %v1615_v44 = vld [vmem:[#allocation9 + $0xa0] sm:$0xf0] }
  0xe3   :  { %v516_v41 = vpop.f32.mrf.mxu0 }
  0xe4   :  { %v529_v43 = vpop.f32.mrf.mxu1  ;;  %967 = vmatpush.bf16.msrb.mxu2 %v1379_v51 }
  0xe5   :  { %v1527_v43 = vor.u32 %v1637_v37, %v1524_v38  ;;  %v1380_v38 = vld [vmem:[#allocation9 + $0x3c] sm:$0xf0] }
  0xe7   :  { %1002 = vmatpush.bf16.msra.mxu1 %v1527_v43  ;;  %v1447_v43 = vor.u32 %v1618_v25, %v1446_v20  ;;  %v1398_v20 = vld [vmem:[#allocation9 + $0x50] sm:$0xf]  ;;  %v566_v25 = vperm.slane %v1955_v6, 2 }
  0xe8   :  { %968 = vmatpush.bf16.msrb.mxu2 %v1367_v5 }
  0xe9   :  { %541 = vadd.xlane.f32.xlu0 %v540_v45  ;;  %v1474_v45 = vld [vmem:[#allocation9 + $0xf0] sm:$0xf] }
  0xec   :  { %969 = vmatpush.bf16.msrb.mxu2 %v1355_v28  ;;  %v1630_v28 = vld [vmem:[#allocation9 + $0x118] sm:$0xf0] }
  0xf0   :  { %1014 = vmatpush.bf16.msra.mxu2 %v1447_v43  ;;  %v1374_v43 = vld [vmem:[#allocation9 + $0x20] sm:$0xf] }
 0x154   :  { %v534_v46 = vpop.xlane.xlu0 %533 }
 0x155   :  { %v1948_v47 = vmul.f32 0.0026041667, %v534_v46  ;;  %v1626_v46 = vld [vmem:[#allocation9 + $0xf8] sm:$0xf0] }
 0x156   :  { %v1475_v55 = vor.u32 %v1626_v46, %v1474_v45  ;;  %v1530_v45 = vld [vmem:[#allocation9 + $0x158] sm:$0xf] }
 0x157   :  { %v544_v49 = vmul.f32 %v1948_v47, %v1948_v47  ;;  %v546_v61 = vsub.f32 %v1933_v32, %v1948_v47  ;;  %v547_v2 = vsub.f32 %v1935_v33, %v1948_v47  ;;  %v1500_v32 = vld [vmem:[#allocation9 + $0x12c] sm:$0xf0]  ;;  %v1450_v33 = vld [vmem:[#allocation9 + $0xc0] sm:$0xf] }
 0x158   :  { %980 = vmatpush.bf16.msrb.mxu3 %v1475_v55  ;;  %v1503_v15 = vor.u32 %v1631_v7, %v1500_v32  ;;  %v1619_v7 = vld [vmem:[#allocation9 + $0xc4] sm:$0xf]  ;;  %v1452_v32 = vld [vmem:[#allocation9 + $0xcc] sm:$0xf0] }
 0x15c   :  { %v542_v48 = vpop.xlane.xlu0 %541 }
 0x15d   :  { %v543_v50 = vmul.f32 0.0026041667, %v542_v48  ;;  %v1610_v48 = vld [vmem:[#allocation9 + $0x7c] sm:$0xf] }
 0x15f   :  { %v545_v56 = vsub.f32 %v543_v50, %v544_v49  ;;  %v1416_v49 = vld [vmem:[#allocation9 + $0x84] sm:$0xf0] }
 0x160   :  { %v1419_v52 = vor.u32 %v1610_v48, %v1416_v49  ;;  %v1639_v49 = vld [vmem:[#allocation9 + $0x160] sm:$0xf0] }
 0x161   :  { %v1952_v58 = vadd.f32 0.001, %v545_v56  ;;  %v1515_v56 = vor.u32 %v1634_v53, %v1512_v54  ;;  %v1598_v53 = vld [vmem:[#allocation9 + $0x1c] sm:$0xf]  ;;  %v1368_v54 = vld [vmem:[#allocation9 + $0x24] sm:$0xf0] }
 0x162   :  { %990 = vmatpush.bf16.msra.mxu0 %v1419_v52  ;;  %v1371_v0 = vor.u32 %v1598_v53, %v1368_v54  ;;  %v1362_v54 = vld [vmem:[#allocation9 + $0x8] sm:$0xf] }
 0x163   :  { %1664 = vrsqrt.f32 %v1952_v58  ;;  %vm556_vm1 = vweird.f32 %v1952_v58  ;;  %1003 = vmatpush.bf16.msra.mxu1 %v1515_v56  ;;  %v1531_v56 = vor.u32 %v1639_v49, %v1530_v45  ;;  %v1624_v45 = vld [vmem:[#allocation9 + $0xe8] sm:$0xf0] }
 0x166   :  { %991 = vmatpush.bf16.msra.mxu0 %v1407_v9 }
 0x167   :  { %1004 = vmatpush.bf16.msra.mxu1 %v1503_v15 }
 0x169   :  { %v1957_v11 = vpop.eup %1664 }
 0x16a   :  { %v551_v16 = vmul.f32 %v1957_v11, %v1952_v58  ;;  %vm557_vm0 = vweird.f32 %v1957_v11  ;;  %v1463_v58 = vor.u32 %v1623_v63, %v1462_v60  ;;  %992 = vmatpush.bf16.msra.mxu0 %v1395_v30  ;;  %v1422_v60 = vld [vmem:[#allocation9 + $0x80] sm:$0xf]  ;;  %v1636_v63 = vld [vmem:[#allocation9 + $0x148] sm:$0xf0] }
 0x16b   :  { %vm558_vm2 = vmor %vm556_vm1, %vm557_vm0 }
 0x16c   :  { %v552_v27 = vmul.f32 %v1957_v11, %v551_v16  ;;  %v1620_v16 = vld [vmem:[#allocation9 + $0xc8] sm:$0xf0]  ;;  %981 = vmatpush.bf16.msrb.mxu3 %v1463_v58  ;;  %v1410_v58 = vld [vmem:[#allocation9 + $0x68] sm:$0xf] }
 0x16d   :  { %v1451_v29 = vor.u32 %v1620_v16, %v1450_v33  ;;  %v1633_v33 = vld [vmem:[#allocation9 + $0x130] sm:$0xf0]  ;;  %v1455_v16 = vor.u32 %v1619_v7, %v1452_v32  ;;  %v1411_v18 = vor.u32 %v1609_v10, %v1410_v58 }
 0x16e   :  { %v553_v41 = vmul.f32 0.5, %v552_v27  ;;  %v1642_v27 = vld [vmem:[#allocation9 + $0x178] sm:$0xf0] }
 0x170   :  { %v554_v50 = vsub.f32 1.5, %v553_v41  ;;  %v1476_v41 = vld [vmem:[#allocation9 + $0xfc] sm:$0xf0]  ;;  %982 = vmatpush.bf16.msrb.mxu3 %v1451_v29 }
 0x171   :  { %v1479_v52 = vor.u32 %v1625_v39, %v1476_v41 }
 0x172   :  { %v555_v62 = vmul.f32 %v1957_v11, %v554_v50  ;;  %v1383_v50 = vor.u32 %v1601_v31, %v1380_v38 }
 0x174   :  { %v1978_v8 = vsel %vm558_vm2, %v1957_v11, %v555_v62  ;;  %v1488_v11 = vld [vmem:[#allocation9 + $0x114] sm:$0xf0]  ;;  %v1518_v62 = vld [vmem:[#allocation9 + $0x140] sm:$0xf]  ;;  %993 = vmatpush.bf16.msra.mxu0 %v1383_v50 }
 0x175   :  { %v560_v13 = vmul.f32 %v1978_v8, %v546_v61  ;;  %v561_v14 = vmul.f32 %v1978_v8, %v547_v2  ;;  %v1491_v37 = vor.u32 %v1628_v19, %v1488_v11  ;;  %v1612_v61 = vld [vmem:[#allocation9 + $0x88] sm:$0xf0]  ;;  %v1595_v2 = vld [vmem:[#allocation9 + $0x4] sm:$0xf]  ;;  %v1519_v5 = vor.u32 %v1636_v63, %v1518_v62 }
 0x176   :  { %v1507_v19 = vor.u32 %v1633_v33, %v1506_v12  ;;  %v548_v11 = vsub.f32 %v1937_v36, %v1948_v47  ;;  %v1627_v36 = vld [vmem:[#allocation9 + $0x100] sm:$0xf0]  ;;  %v2004_v12 = vld [vmem:[#allocation6 + $0x8] sm:$0xff] }
 0x177   :  { %v570_v21 = vmul.f32 %v564_v23, %v560_v13  ;;  %v571_v24 = vmul.f32 %v565_v42, %v561_v14  ;;  %v1543_v23 = vor.u32 %v1642_v27, %v1542_v26  ;;  %v1434_v42 = vld [vmem:[#allocation9 + $0x98] sm:$0xf]  ;;  %1005 = vmatpush.bf16.msra.mxu1 %v1491_v37  ;;  %v1494_v27 = vld [vmem:[#allocation9 + $0x110] sm:$0xf] }
 0x178   :  { %v1435_v55 = vor.u32 %v1615_v44, %v1434_v42  ;;  %994 = vmatpush.bf16.msra.mxu0 %v1371_v0  ;;  %v562_v29 = vmul.f32 %v1978_v8, %v548_v11  ;;  %v1495_v31 = vor.u32 %v1630_v28, %v1494_v27  ;;  %v1482_v37 = vld [vmem:[#allocation9 + $0xf8] sm:$0xf]  ;;  %v576_v42 = vperm.slane %v1963_v40, 2  ;;  %v1470_v44 = vld [vmem:[#allocation9 + $0xe0] sm:$0xf] }
 0x179   :  { %v580_v34 = vadd.f32 %v574_v3, %v570_v21  ;;  %v581_v35 = vadd.f32 %v575_v4, %v571_v24  ;;  %1027 = vmatpush.bf16.msra.mxu3 %v1543_v23  ;;  %v1356_v3 = vld [vmem:[#allocation9 + $0xc] sm:$0xf0]  ;;  %v1423_v4 = vor.u32 %v1612_v61, %v1422_v60  ;;  %v1606_v21 = vld [vmem:[#allocation9 + $0x58] sm:$0xf0]  ;;  %v1483_v6 = vor.u32 %v1627_v36, %v1482_v37  ;;  %v1600_v23 = vld [vmem:[#allocation9 + $0x28] sm:$0xf0] }
 0x17a   :  { %1015 = vmatpush.bf16.msra.mxu2 %v1435_v55  ;;  %v1359_v14 = vor.u32 %v1595_v2, %v1356_v3  ;;  %v1399_v26 = vor.u32 %v1606_v21, %v1398_v20  ;;  %v1471_v53 = vor.u32 %v1624_v45, %v1470_v44  ;;  %v1597_v55 = vld [vmem:[#allocation9 + $0x10] sm:$0xf0] }
 0x17b   :  { %v1349_v46 = vmul.f32 -1.442695, %v580_v34  ;;  %v1350_v48 = vadd.f32 -1.0, %v581_v35  ;;  %1006 = vmatpush.bf16.msra.mxu1 %v1479_v52  ;;  %v1386_v34 = vld [vmem:[#allocation9 + $0x38] sm:$0xf]  ;;  %v1363_v63 = vor.u32 %v1597_v55, %v1362_v54 }
 0x17c   :  { %995 = vmatpush.bf16.msra.mxu0 %v1359_v14  ;;  %v1603_v35 = vld [vmem:[#allocation9 + $0x40] sm:$0xf0] }
 0x17d   :  { %1666 = vpow2.f32 %v1349_v46  ;;  %v1351_v51 = vmul.f32 -1.442695, %v1350_v48  ;;  %1028 = vmatpush.bf16.msra.mxu3 %v1531_v56  ;;  %v1387_v39 = vor.u32 %v1603_v35, %v1386_v34  ;;  %v572_v46 = vmul.f32 %v566_v25, %v562_v29  ;;  %v1458_v56 = vld [vmem:[#allocation9 + $0xc8] sm:$0xf] }
 0x17e   :  { %1016 = vmatpush.bf16.msra.mxu2 %v1423_v4 }
 0x17f   :  { %1668 = vpow2.f32 %v1351_v51  ;;  %1007 = vmatpush.bf16.msra.mxu1 %v1467_v1  ;;  %v1375_v51 = vor.u32 %v1600_v23, %v1374_v43  ;;  %v582_v59 = vadd.f32 %v576_v42, %v572_v46  ;;  %v1459_v1 = vor.u32 %v1621_v57, %v1458_v56 }
 0x181   :  { %1029 = vmatpush.bf16.msra.mxu3 %v1519_v5 }
 0x182   :  { %1017 = vmatpush.bf16.msra.mxu2 %v1411_v18 }
 0x183   :  { %v1667_v9 = vpop.eup %1666  ;;  %1008 = vmatpush.bf16.msra.mxu1 %v1455_v16 }
 0x184   :  { %v1984_v13 = vadd.f32 1.0, %v1667_v9 }
 0x185   :  { %v1669_v15 = vpop.eup %1668  ;;  %1030 = vmatpush.bf16.msra.mxu3 %v1507_v19 }
 0x186   :  { %1670 = vrcp.f32 %v1984_v13  ;;  %v1987_v17 = vadd.f32 1.0, %v1669_v15  ;;  %1018 = vmatpush.bf16.msra.mxu2 %v1399_v26  ;;  %v598_v8 = vand.u32 2147483648, %v1984_v13  ;;  %v596_v49 = vand.u32 2147483647, %v1984_v13 }
 0x187   :  { %vm592_vm4 = vweird.f32 %v1984_v13 }
 0x188   :  { %1672 = vrcp.f32 %v1987_v17  ;;  %v599_v40 = vor.u32 1.1754944e-38, %v598_v8  ;;  %vm597_vm6 = vcmp.eq.f32.partialorder %v596_v49, 8.507059e+37  ;;  %v618_v3 = vand.u32 2147483648, %v1987_v17 }
 0x189   :  { %1031 = vmatpush.bf16.msra.mxu3 %v1495_v31  ;;  %vm612_vm8 = vweird.f32 %v1987_v17  ;;  %v616_v4 = vand.u32 2147483647, %v1987_v17 }
 0x18a   :  { %1019 = vmatpush.bf16.msra.mxu2 %v1387_v39  ;;  %v619_v32 = vor.u32 1.1754944e-38, %v618_v3 }
 0x18b   :  { %vm617_vm10 = vcmp.eq.f32.partialorder %v616_v4, 8.507059e+37 }
 0x18c   :  { %v1671_v24 = vpop.eup %1670 }
 0x18d   :  { %v588_v30 = vmul.f32 %v1671_v24, %v1984_v13  ;;  %vm593_vm3 = vweird.f32 %v1671_v24  ;;  %1032 = vmatpush.bf16.msra.mxu3 %v1483_v6 }
 0x18e   :  { %v1673_v38 = vpop.eup %1672  ;;  %vm594_vm5 = vmor %vm592_vm4, %vm593_vm3  ;;  %1020 = vmatpush.bf16.msra.mxu2 %v1375_v51  ;;  %v115_v51 = vld [vmem:[#allocation11 + $0x3] sm:$0x7] }
 0x18f   :  { %v589_v47 = vsub.f32 1.0, %v588_v30  ;;  %v608_v41 = vmul.f32 %v1673_v38, %v1987_v17  ;;  %vm613_vm7 = vweird.f32 %v1673_v38  ;;  %v1073_v56 = vperm.slane %v115_v51, 0 }
 0x190   :  { %vm614_vm9 = vmor %vm612_vm8, %vm613_vm7  ;;  %v1074_v57 = vperm.slane %v115_v51, 1 }
 0x191   :  { %v590_v48 = vmul.f32 %v1671_v24, %v589_v47  ;;  %v609_v50 = vsub.f32 1.0, %v608_v41  ;;  %1033 = vmatpush.bf16.msra.mxu3 %v1471_v53  ;;  %v117_v53 = vld [vmem:[#allocation12 + $0x3] sm:$0x7] }
 0x192   :  { %1021 = vmatpush.bf16.msra.mxu2 %v1363_v63 }
 0x193   :  { %v591_v52 = vadd.f32 %v1671_v24, %v590_v48  ;;  %v610_v62 = vmul.f32 %v1673_v38, %v609_v50 }
 0x195   :  { %v595_v60 = vsel %vm594_vm5, %v1671_v24, %v591_v52  ;;  %v611_v2 = vadd.f32 %v1673_v38, %v610_v62  ;;  %1034 = vmatpush.bf16.msra.mxu3 %v1459_v1 }
 0x196   :  { %v600_v61 = vsel %vm597_vm6, %v599_v40, %v595_v60  ;;  %v1083_v60 = vperm.slane %v117_v53, 0 }
 0x197   :  { %v622_v0 = vmul.f32 %v600_v61, %v582_v59  ;;  %v615_v5 = vsel %vm614_vm9, %v1673_v38, %v611_v2  ;;  %v1084_v61 = vperm.slane %v117_v53, 1 }
 0x198   :  { %v620_v9 = vsel %vm617_vm10, %v619_v32, %v615_v5 }
 0x199   :  { %1674 = vtanh.f32 %v622_v0 }
 0x19f   :  { %v1675_v7 = vpop.eup %1674 }
 0x1a0   :  { %v624_v58 = vsub.f32 %v1675_v7, %v1930_v22 }
 0x1a2   :  { %v625_v10 = vmul.f32 %v624_v58, %v620_v9 }
 0x1a4   :  { %v626_v33 = vadd.f32 %v625_v10, %v1930_v22 }
 0x1a6   :  { %v1651_v13 = vpack.c.bf16 %v2004_v12, %v626_v33  ;;  %627 = vst [vmem:[#allocation14] sm:$0xff] %v626_v33 }
 0x1a8   :  { %v700_v14 = vunpack.c.l.b16 %v1651_v13  ;;  %v701_v15 = vunpack.c.h.b16 %v1651_v13 }
 0x1aa   :  { %v702_v16 = vpack.c.b16 %v700_v14, %v700_v14  ;;  %v703_v17 = vpack.c.b16 %v701_v15, %v701_v15  ;;  %v1075_v14 = vperm.slane %v115_v51, 2 }
 0x1ac   :  { %970 = vmatmul.bf16.vlgmr.msrb.gmra.mxu2 %v702_v16  ;;  %983 = vmatmul.bf16.vlgmr.msrb.gmra.mxu3 %v703_v17 }
 0x1ad   :  { %996 = vmatmul.bf16.vlgmr.msra.gmra.mxu0 %v702_v16  ;;  %1009 = vmatmul.bf16.vlgmr.msra.gmra.mxu1 %v703_v17 }
 0x1bc   :  { %1022 = vmatmul.bf16.vlgmr.msra.gmra.mxu2 %v702_v16  ;;  %1035 = vmatmul.bf16.vlgmr.msra.gmra.mxu3 %v703_v17 }
 0x22a   :  { %v997_v18 = vpop.f32.mrf.mxu0  ;;  %v1010_v19 = vpop.f32.mrf.mxu1 }
 0x22b   :  { %v1011_v27 = vadd.f32 %v1010_v19, %v997_v18 }
 0x22d   :  { %v1046_v37 = vmul.f32 %v1011_v27, %v1011_v27 }
 0x22f   :  { %v971_v11 = vpop.f32.mrf.mxu2  ;;  %v984_v20 = vpop.f32.mrf.mxu3 }
 0x230   :  { %v985_v26 = vadd.f32 %v984_v20, %v971_v11  ;;  %v1085_v11 = vperm.slane %v117_v53, 2 }
 0x232   :  { %v999_v21 = vpop.f32.mrf.mxu0  ;;  %v1012_v24 = vpop.f32.mrf.mxu1  ;;  %v1040_v31 = vadd.f32 %v1011_v27, %v985_v26  ;;  %v1045_v35 = vmul.f32 %v985_v26, %v985_v26 }
 0x234   :  { %v1048_v47 = vadd.f32 %v1046_v37, %v1045_v35 }
 0x237   :  { %v973_v22 = vpop.f32.mrf.mxu2  ;;  %v986_v25 = vpop.f32.mrf.mxu3 }
 0x23f   :  { %v1023_v28 = vpop.f32.mrf.mxu2  ;;  %v1036_v29 = vpop.f32.mrf.mxu3 }
 0x240   :  { %v1037_v30 = vadd.f32 %v1036_v29, %v1023_v28 }
 0x242   :  { %v1041_v34 = vadd.f32 %v1040_v31, %v1037_v30  ;;  %v1047_v38 = vmul.f32 %v1037_v30, %v1037_v30 }
 0x244   :  { %1042 = vadd.xlane.f32.xlu1 %v1041_v34  ;;  %v1049_v41 = vadd.f32 %v1048_v47, %v1047_v38 }
 0x247   :  { %v1025_v39 = vpop.f32.mrf.mxu2  ;;  %v1038_v36 = vpop.f32.mrf.mxu3 }
 0x24c   :  { %1050 = vadd.xlane.f32.xlu1 %v1049_v41 }
 0x2b7   :  { %v1043_v6 = vpop.xlane.xlu1 %1042 }
 0x2b8   :  { %v1044_v43 = vmul.f32 0.0026041667, %v1043_v6 }
 0x2ba   :  { %v1053_v42 = vmul.f32 %v1044_v43, %v1044_v43  ;;  %v1055_v55 = vsub.f32 %v985_v26, %v1044_v43  ;;  %v1056_v40 = vsub.f32 %v1011_v27, %v1044_v43  ;;  %v1057_v33 = vsub.f32 %v1037_v30, %v1044_v43 }
 0x2bf   :  { %v1051_v23 = vpop.xlane.xlu1 %1050 }
 0x2c0   :  { %v1052_v8 = vmul.f32 0.0026041667, %v1051_v23 }
 0x2c2   :  { %v1054_v44 = vsub.f32 %v1052_v8, %v1053_v42 }
 0x2c4   :  { %v1058_v45 = vadd.f32 0.001, %v1054_v44 }
 0x2c6   :  { %1676 = vrsqrt.f32 %v1058_v45  ;;  %vm1065_vm12 = vweird.f32 %v1058_v45 }
 0x2cc   :  { %v1677_v46 = vpop.eup %1676 }
 0x2cd   :  { %v1060_v48 = vmul.f32 %v1677_v46, %v1058_v45  ;;  %vm1066_vm11 = vweird.f32 %v1677_v46 }
 0x2ce   :  { %vm1067_vm13 = vmor %vm1065_vm12, %vm1066_vm11 }
 0x2cf   :  { %v1061_v49 = vmul.f32 %v1677_v46, %v1060_v48 }
 0x2d1   :  { %v1062_v50 = vmul.f32 0.5, %v1061_v49 }
 0x2d3   :  { %v1063_v52 = vsub.f32 1.5, %v1062_v50 }
 0x2d5   :  { %v1064_v54 = vmul.f32 %v1677_v46, %v1063_v52 }
 0x2d7   :  { %v1068_v59 = vsel %vm1067_vm13, %v1677_v46, %v1064_v54 }
 0x2d8   :  { %v1069_v62 = vmul.f32 %v1068_v59, %v1055_v55  ;;  %v1070_v63 = vmul.f32 %v1068_v59, %v1056_v40  ;;  %v1071_v15 = vmul.f32 %v1068_v59, %v1057_v33 }
 0x2da   :  { %v1079_v0 = vmul.f32 %v1073_v56, %v1069_v62  ;;  %v1080_v1 = vmul.f32 %v1074_v57, %v1070_v63  ;;  %v1081_v21 = vmul.f32 %v1075_v14, %v1071_v15 }
 0x2dc   :  { %v1089_v2 = vadd.f32 %v1083_v60, %v1079_v0  ;;  %v1090_v3 = vadd.f32 %v1084_v61, %v1080_v1  ;;  %v1091_v28 = vadd.f32 %v1085_v11, %v1081_v21 }
 0x2de   :  { %v1544_v4 = vmul.f32 -1.442695, %v1089_v2  ;;  %v1545_v5 = vadd.f32 -1.0, %v1090_v3 }
 0x2e0   :  { %1678 = vpow2.f32 %v1544_v4  ;;  %v1546_v7 = vmul.f32 -1.442695, %v1545_v5 }
 0x2e2   :  { %1680 = vpow2.f32 %v1546_v7 }
 0x2e6   :  { %v1679_v32 = vpop.eup %1678 }
 0x2e7   :  { %v1095_v58 = vadd.f32 1.0, %v1679_v32 }
 0x2e8   :  { %v1681_v9 = vpop.eup %1680 }
 0x2e9   :  { %1682 = vrcp.f32 %v1095_v58  ;;  %v1115_v10 = vadd.f32 1.0, %v1681_v9  ;;  %v1107_v20 = vand.u32 2147483648, %v1095_v58  ;;  %v1105_v22 = vand.u32 2147483647, %v1095_v58 }
 0x2ea   :  { %vm1101_vm15 = vweird.f32 %v1095_v58 }
 0x2eb   :  { %1684 = vrcp.f32 %v1115_v10  ;;  %v1108_v27 = vor.u32 1.1754944e-38, %v1107_v20  ;;  %vm1106_vm1 = vcmp.eq.f32.partialorder %v1105_v22, 8.507059e+37  ;;  %v1127_v37 = vand.u32 2147483648, %v1115_v10 }
 0x2ec   :  { %vm1121_vm3 = vweird.f32 %v1115_v10  ;;  %v1125_v38 = vand.u32 2147483647, %v1115_v10 }
 0x2ed   :  { %v1128_v47 = vor.u32 1.1754944e-38, %v1127_v37 }
 0x2ee   :  { %vm1126_vm5 = vcmp.eq.f32.partialorder %v1125_v38, 8.507059e+37 }
 0x2ef   :  { %v1683_v13 = vpop.eup %1682 }
 0x2f0   :  { %v1097_v16 = vmul.f32 %v1683_v13, %v1095_v58  ;;  %vm1102_vm14 = vweird.f32 %v1683_v13 }
 0x2f1   :  { %v1685_v17 = vpop.eup %1684  ;;  %vm1103_vm0 = vmor %vm1101_vm15, %vm1102_vm14 }
 0x2f2   :  { %v1098_v18 = vsub.f32 1.0, %v1097_v16  ;;  %v1117_v19 = vmul.f32 %v1685_v17, %v1115_v10  ;;  %vm1122_vm2 = vweird.f32 %v1685_v17 }
 0x2f3   :  { %vm1123_vm4 = vmor %vm1121_vm3, %vm1122_vm2 }
 0x2f4   :  { %v1099_v24 = vmul.f32 %v1683_v13, %v1098_v18  ;;  %v1118_v25 = vsub.f32 1.0, %v1117_v19 }
 0x2f6   :  { %v1100_v26 = vadd.f32 %v1683_v13, %v1099_v24  ;;  %v1119_v31 = vmul.f32 %v1685_v17, %v1118_v25 }
 0x2f8   :  { %v1104_v29 = vsel %vm1103_vm0, %v1683_v13, %v1100_v26  ;;  %v1120_v35 = vadd.f32 %v1685_v17, %v1119_v31 }
 0x2f9   :  { %v1109_v30 = vsel %vm1106_vm1, %v1108_v27, %v1104_v29 }
 0x2fa   :  { %v1131_v34 = vmul.f32 %v1109_v30, %v1091_v28  ;;  %v1124_v39 = vsel %vm1123_vm4, %v1685_v17, %v1120_v35 }
 0x2fb   :  { %v1129_v6 = vsel %vm1126_vm5, %v1128_v47, %v1124_v39 }
 0x2fc   :  { %1686 = vtanh.f32 %v1131_v34 }
 0x302   :  { %v1687_v36 = vpop.eup %1686 }
 0x303   :  { %v1133_v41 = vsub.f32 %v1687_v36, %v2004_v12 }
 0x305   :  { %v1134_v43 = vmul.f32 %v1133_v41, %v1129_v6 }
 0x307   :  { %v1135_v23 = vadd.f32 %v1134_v43, %v2004_v12 }
 0x309   :  { %1136 = vst [vmem:[#allocation14 + $0x8] sm:$0xff] %v1135_v23 }
 0x30a   :  { %1147 = dma.vmem_to_hbm [thread:$0]  %s1143_s5, 256, %s1145_s29, [#allocation5]  }
 0x30b   :  { %1864 = dma.done.wait [#allocation5], 256  }
 0x30c   :  { %1865 = vsyncadd [#allocation5], 4294967040 }
 0x30d   :  { %1152 = vsyncpa [#allocation4], 1 }
 0x30e   :  { %1153 = vsyncpa [#allocation7], 1 }
 0x30f   :  { %1154 = vsyncpa [#allocation10], 1 }
 0x310   :  { %1155 = vsyncpa [#allocation13], 1 }
 0x311   :  { %1156 = vsyncpa [#allocation5], 1 }

</bundles_post_ra>
